<compile_context>
chip_gen: v5e
topology: v5e:2x2
jax: 0.10.0
libtpu: 0.0.40
codegen_flags: <defaults>
</compile_context>

<pallas_src>
import jax
import jax.numpy as jnp
from jax.experimental import pallas as pl
from jax.experimental.pallas import tpu as pltpu

BETA = 50.0
INV_BETA = 1.0 / BETA
SOFTPLUS_THRESHOLD = 20.0  # PyTorch default: softplus is linear when beta*x > 20
LANE = 128
DEFAULT_TILE_BYTES = 4 << 20  # ~4 MiB per input block


def _smooth_clamped_relu_kernel(x_ref, o_ref):
    x = x_ref[...].astype(jnp.float32)

    bx = BETA * x
    w = bx - BETA                              # == beta*(x - 1); one sub instead of mul+sub
    inner_linear = bx > SOFTPLUS_THRESHOLD     # F.softplus(x) linear fallback

    # One exp + one log1p per element (instead of 2 + 2): the two softplus
    # calls are branch-exclusive per element.
    #  * inner log branch (bx <= 20): the outer softplus argument is
    #    <= 20 - 50 = -30, so its value (<= ~1.9e-15) is below half an ulp of
    #    the f32 result and is dropped.
    #  * inner linear branch (bx > 20): activated == x, so we need
    #    softplus(x - 1) = log1p(exp(min(w, 20))) / beta.
    arg = jnp.minimum(jnp.where(inner_linear, w, bx), SOFTPLUS_THRESHOLD)
    sp = INV_BETA * jnp.log1p(jnp.exp(arg))

    # inner linear branch: out = x - softplus(x - 1).  When the outer softplus
    # is also linear (w > 20) this is x - (x - 1), which equals 1.0 exactly for
    # |x| < 2^24; using the constant saves two VALU ops (diverges from
    # PyTorch's literal float math only for astronomically large inputs).
    out_lin = jnp.where(w > SOFTPLUS_THRESHOLD, jnp.float32(1.0), x - sp)
    # inner log branch: out = softplus(x) - (negligible) == sp
    out = jnp.where(inner_linear, out_lin, sp)

    o_ref[...] = out.astype(o_ref.dtype)


def _tensorcores_per_chip():
    """Best-effort TensorCores-per-chip query (2 on v7x, 1 on v5e/v6e)."""
    try:
        info = pltpu.get_tpu_info()
    except Exception:
        return 1
    for name in ("num_cores", "num_tensorcores", "tensorcores_per_chip",
                 "cores_per_chip"):
        v = getattr(info, name, None)
        if v:
            try:
                return max(1, int(v))
            except Exception:
                pass
    # v7x is the only generation with 64 MiB VMEM per TensorCore (2 TCs/chip);
    # v5e/v6e have 128 MiB VMEM and a single TensorCore.
    try:
        vmem = int(getattr(info, "vmem_capacity_bytes", 128 << 20))
    except Exception:
        vmem = 128 << 20
    return 2 if vmem <= (64 << 20) else 1


# ----------------------- exact PyTorch-semantics jnp path ---------------------
def _softplus_f32(x):
    bx = BETA * x
    sp = INV_BETA * jnp.log1p(jnp.exp(jnp.minimum(bx, SOFTPLUS_THRESHOLD)))
    return jnp.where(bx > SOFTPLUS_THRESHOLD, x, sp)


def _smooth_clamped_relu_jnp(x):
    """Exact two-softplus formula (used for <128-element tails and as reference)."""
    xf = x.astype(jnp.float32)
    act = _softplus_f32(xf)
    return (act - _softplus_f32(act - 1.0)).astype(x.dtype)


def smooth_clamped_relu(x, *, tile_bytes=DEFAULT_TILE_BYTES):
    """Apply SmoothClampedReLU (beta=50) elementwise to an array of any shape."""
    orig_shape = x.shape
    orig_dtype = x.dtype
    flat = x.reshape(-1)
    n = flat.shape[0]
    if n == 0:
        return x

    itemsize = jnp.dtype(orig_dtype).itemsize
    n_aligned = (n // LANE) * LANE
    tail = n - n_aligned

    if n_aligned == 0:
        # Fewer than 128 elements: a kernel launch is pure overhead.
        return _smooth_clamped_relu_jnp(flat).reshape(orig_shape)

    rows = n_aligned // LANE
    head = flat if tail == 0 else flat[:n_aligned]
    x2d = head.reshape(rows, LANE)

    # Sublane-aligned row block: 8 rows per (8,128) f32 tile, 16 for 16-bit, ...
    packing = max(1, 4 // itemsize)
    min_br = 8 * packing

    if rows <= min_br:
        # Single block equal to the full array dims (legal regardless of (8,128)).
        br = rows
    else:
        # Dtype-aware ~tile_bytes block (same bytes/step for f32/bf16/int8);
        # never larger than the array (Pallas masks the partial last block).
        br_full = max(min_br, (tile_bytes // (LANE * itemsize)) // min_br * min_br)
        br = min(br_full, (rows // min_br) * min_br)
        cores = _tensorcores_per_chip()
        if cores > 1:
            # 2-TC chips (v7x): keep >= 2 grid steps per core so each core's
            # pipeline retains double-buffering overlap.  Single-TC chips
            # (v5e/v6e) get no forced split -> maximal tiles.
            per_step = pl.cdiv(pl.cdiv(rows, 2 * cores), min_br) * min_br
            br = max(min_br, min(br, per_step))

    grid = (pl.cdiv(rows, br),)

    tile_b = br * LANE * itemsize
    # in + out, double-buffered (= 4x tile), plus headroom for internal scratch.
    # Overrides v5e's 16 MiB default scoped limit; stays under v7x's 64 MiB VMEM.
    vmem_limit = int(min(48 << 20, max(32 << 20, 4 * tile_b + (8 << 20))))

    out2d = pl.pallas_call(
        _smooth_clamped_relu_kernel,
        out_shape=jax.ShapeDtypeStruct((rows, LANE), orig_dtype),
        grid_spec=pltpu.PrefetchScalarGridSpec(
            num_scalar_prefetch=0,
            grid=grid,
            in_specs=[pl.BlockSpec((br, LANE), lambda i: (i, 0))],
            out_specs=pl.BlockSpec((br, LANE), lambda i: (i, 0)),
        ),
        compiler_params=pltpu.CompilerParams(
            dimension_semantics=("parallel",),
            vmem_limit_bytes=vmem_limit,
        ),
        cost_estimate=pl.CostEstimate(
            flops=12 * n_aligned,
            transcendentals=2 * n_aligned,
            bytes_accessed=2 * n_aligned * itemsize,
        ),
    )(x2d)

    out = out2d.reshape(-1)
    if tail:
        # TODO(synk): the concatenate still re-copies the aligned prefix once;
        # fully removing it would need a 1D / manual-DMA kernel for ragged tails.
        out = jnp.concatenate([out, _smooth_clamped_relu_jnp(flat[n_aligned:])])
    return out.reshape(orig_shape)


if __name__ == "__main__":
    key = jax.random.PRNGKey(0)
    # NCHW, as the PyTorch module would typically receive.
    x = jax.random.normal(key, (2, 4, 16, 16), dtype=jnp.float32) * 2.0

    y = jax.block_until_ready(smooth_clamped_relu(x))
    y_ref = _smooth_clamped_relu_jnp(x)
    assert y.shape == x.shape and y.dtype == x.dtype
    assert jnp.allclose(y, y_ref, atol=1e-6, rtol=1e-6), float(
        jnp.max(jnp.abs(y - y_ref)))

    # Ragged numel (not a multiple of 128): aligned-prefix kernel + jnp tail.
    x2 = jax.random.normal(jax.random.PRNGKey(1), (3, 5, 7, 11),
                           dtype=jnp.float32) * 2.0
    y2 = jax.block_until_ready(smooth_clamped_relu(x2))
    assert jnp.allclose(y2, _smooth_clamped_relu_jnp(x2), atol=1e-6, rtol=1e-6)

    # Tiny input (< 128 elements): pure-jnp fallback path.
    x3 = jax.random.normal(jax.random.PRNGKey(2), (5, 7), dtype=jnp.float32)
    y3 = jax.block_until_ready(smooth_clamped_relu(x3))
    assert jnp.allclose(y3, _smooth_clamped_relu_jnp(x3), atol=1e-6, rtol=1e-6)

    print("KERNEL_OK")
</pallas_src>

<mosaic_0001>
module attributes {stable_mosaic.version = 11 : i64} {
  func.func @_smooth_clamped_relu_kernel(%arg0: i32, %arg1: memref<16x128xf32, #tpu.memory_space<vmem>>, %arg2: memref<16x128xf32, #tpu.memory_space<vmem>>) attributes {dimension_semantics = [#tpu.dimension_semantics<parallel>], iteration_bounds = array<i64: 1>, scalar_prefetch = 0 : i64, scratch_operands = 0 : i64, tpu.core_type = #tpu.core_type<tc>, window_params = [{transform_indices = @transform_0, window_bounds = array<i64: 16, 128>}, {transform_indices = @transform_1, window_bounds = array<i64: 16, 128>}]} {
    %c0 = arith.constant 0 : index
    %c0_0 = arith.constant 0 : index
    %0 = vector.load %arg1[%c0, %c0_0] : memref<16x128xf32, #tpu.memory_space<vmem>>, vector<16x128xf32>
    %cst = arith.constant 5.000000e+01 : f32
    %1 = vector.broadcast %cst : f32 to vector<16x128xf32>
    %2 = arith.mulf %1, %0 : vector<16x128xf32>
    %cst_1 = arith.constant 5.000000e+01 : f32
    %3 = vector.broadcast %cst_1 : f32 to vector<16x128xf32>
    %4 = arith.subf %2, %3 : vector<16x128xf32>
    %cst_2 = arith.constant 2.000000e+01 : f32
    %5 = vector.broadcast %cst_2 : f32 to vector<16x128xf32>
    %6 = arith.cmpf ogt, %2, %5 : vector<16x128xf32>
    %7 = arith.select %6, %4, %2 : vector<16x128xi1>, vector<16x128xf32>
    %cst_3 = arith.constant 2.000000e+01 : f32
    %8 = vector.broadcast %cst_3 : f32 to vector<16x128xf32>
    %9 = arith.minimumf %7, %8 : vector<16x128xf32>
    %10 = math.exp %9 : vector<16x128xf32>
    %11 = math.log1p %10 : vector<16x128xf32>
    %cst_4 = arith.constant 2.000000e-02 : f32
    %12 = vector.broadcast %cst_4 : f32 to vector<16x128xf32>
    %13 = arith.mulf %12, %11 : vector<16x128xf32>
    %cst_5 = arith.constant 2.000000e+01 : f32
    %14 = vector.broadcast %cst_5 : f32 to vector<16x128xf32>
    %15 = arith.cmpf ogt, %4, %14 : vector<16x128xf32>
    %16 = arith.subf %0, %13 : vector<16x128xf32>
    %cst_6 = arith.constant 1.000000e+00 : f32
    %17 = vector.broadcast %cst_6 : f32 to vector<16x128xf32>
    %18 = arith.select %15, %17, %16 : vector<16x128xi1>, vector<16x128xf32>
    %19 = arith.select %6, %18, %13 : vector<16x128xi1>, vector<16x128xf32>
    %c0_7 = arith.constant 0 : index
    %c0_8 = arith.constant 0 : index
    %20 = vector.load %arg2[%c0_7, %c0_8] : memref<16x128xf32, #tpu.memory_space<vmem>>, vector<16x128xf32>
    tpu.vector_store %arg2[%c0_7, %c0_8], %19 {strides = array<i32>} : memref<16x128xf32, #tpu.memory_space<vmem>>, vector<16x128xf32>,
    return
  }
  func.func @transform_0(%arg0: i32) -> (i32, i32) {
    %c0_i32 = arith.constant 0 : i32
    %c0_i32_0 = arith.constant 0 : i32
    return %arg0, %c0_i32 : i32, i32
  }
  func.func @transform_1(%arg0: i32) -> (i32, i32) {
    %c0_i32 = arith.constant 0 : i32
    %c0_i32_0 = arith.constant 0 : i32
    return %arg0, %c0_i32 : i32, i32
  }
}

</mosaic_0001>

<bundles_post_ra>
// kernel: tpu_custom_call.1
= control target key start
LH: loop header
LB: loop body
LE: loop exit
PB: predicated region body
PF: predicated region fallthrough
CT: control target
= control target key end

     0   :  { %6 = vsyncpa [#allocation3], 0  ;;  %s186_s0 = inlined_call_operand.hbm [shape: f32[16,128], index: 0, kind: input, shape index: {}]   ;;  %s187_s1 = inlined_call_operand.hbm [shape: f32[16,128], index: 1, kind: output, shape index: {}]  }
   0x1   :  { %7 = vsyncpa [#allocation4], 0  ;;  %s12_s8 = sshll.u32 %s186_s0, 4  ;;  %s156_s9 = smov [#allocation2]   ;;  %s13_s8 = int_to_ptr.hbm [resolvable:$true] %s12_s8 }
   0x2   :  { %s14_s10 = sshll.u32 %s156_s9, 4  ;;  %s157_s11 = smov 128   ;;  %s15_s10 = int_to_ptr.vmem [resolvable:$true] %s14_s10 }
   0x3   :  { %s158_s12 = smov 8  }
   0x4   :  { %20 = dma.hbm_to_vmem [thread:$0]  %s13_s8, 256, %s15_s10, [#allocation3], %s157_s11, %s157_s11, %s158_s12  }
   0x5   :  { %152 = dma.done.wait [#allocation3], 256  }
   0x6   :  { %153 = vsyncadd [#allocation3], 4294967040  ;;  %v25_v0 = vld [vmem:[#allocation2] sm:$0xff]  ;;  %v26_v1 = vld [vmem:[#allocation2 + $0x8] sm:$0xff]  ;;  %s159_s0 = smov [#allocation5]   ;;  %s77_s16 = sshll.u32 %s187_s1, 4  ;;  %s78_s16 = int_to_ptr.hbm [resolvable:$true] %s77_s16 }
   0x7   :  { %v27_v2 = vmul.f32 50.0, %v25_v0  ;;  %v28_v3 = vmul.f32 50.0, %v26_v1  ;;  %s75_s13 = sshll.u32 %s159_s0, 4  ;;  %s76_s13 = int_to_ptr.vmem [resolvable:$true] %s75_s13 }
   0x9   :  { %v90_v4 = vadd.f32 -50.0, %v27_v2  ;;  %vm31_vm0 = vcmp.gt.f32.partialorder %v27_v2, 20.0  ;;  %v91_v5 = vadd.f32 -50.0, %v28_v3  ;;  %vm32_vm1 = vcmp.gt.f32.partialorder %v28_v3, 20.0 }
   0xb   :  { %v33_v6 = vsel %vm31_vm0, %v90_v4, %v27_v2  ;;  %v34_v7 = vsel %vm32_vm1, %v91_v5, %v28_v3  ;;  %vm61_vm4 = vcmp.gt.f32.partialorder %v90_v4, 20.0  ;;  %vm62_vm5 = vcmp.gt.f32.partialorder %v91_v5, 20.0 }
   0xc   :  { %v35_v8 = vmin.f32 %v33_v6, 20.0  ;;  %v36_v9 = vmin.f32 %v34_v7, 20.0 }
   0xe   :  { %v37_v10 = vmul.f32 1.442695, %v35_v8  ;;  %v39_v11 = vmul.f32 1.442695, %v36_v9 }
  0x10   :  { %96 = vpow2.f32 %v37_v10 }
  0x11   :  { %98 = vpow2.f32 %v39_v11 }
  0x16   :  { %v97_v12 = vpop.eup %96 }
  0x17   :  { %v99_v13 = vpop.eup %98  ;;  %v41_v14 = vadd.f32 1.0, %v97_v12  ;;  %v44_v15 = vmul.f32 -0.5, %v97_v12  ;;  %v47_v19 = vand.u32 2147483647, %v97_v12 }
  0x18   :  { %v50_v16 = vadd.f32 1.0, %v99_v13  ;;  %v53_v17 = vmul.f32 -0.5, %v99_v13  ;;  %v56_v21 = vand.u32 2147483647, %v99_v13 }
  0x19   :  { %100 = vlog2.f32 %v41_v14  ;;  %v45_v18 = vadd.f32 1.0, %v44_v15  ;;  %vm48_vm2 = vcmp.lt.f32.partialorder %v47_v19, 0.0004427343 }
  0x1a   :  { %102 = vlog2.f32 %v50_v16  ;;  %v54_v20 = vadd.f32 1.0, %v53_v17  ;;  %vm57_vm3 = vcmp.lt.f32.partialorder %v56_v21, 0.0004427343 }
  0x1b   :  { %v46_v22 = vmul.f32 %v97_v12, %v45_v18 }
  0x1c   :  { %v55_v24 = vmul.f32 %v99_v13, %v54_v20 }
  0x1f   :  { %v101_v23 = vpop.eup %100 }
  0x20   :  { %v103_v25 = vpop.eup %102  ;;  %v43_v26 = vmul.f32 0.6931472, %v101_v23 }
  0x21   :  { %v52_v27 = vmul.f32 0.6931472, %v103_v25 }
  0x22   :  { %v49_v28 = vsel %vm48_vm2, %v46_v22, %v43_v26 }
  0x23   :  { %v59_v29 = vmul.f32 0.02, %v49_v28  ;;  %v58_v30 = vsel %vm57_vm3, %v55_v24, %v52_v27 }
  0x24   :  { %v60_v31 = vmul.f32 0.02, %v58_v30 }
  0x25   :  { %v63_v32 = vsub.f32 %v25_v0, %v59_v29 }
  0x26   :  { %v64_v33 = vsub.f32 %v26_v1, %v60_v31 }
  0x27   :  { %v65_v34 = vsel %vm61_vm4, 1.0, %v63_v32 }
  0x28   :  { %v67_v35 = vsel %vm31_vm0, %v65_v34, %v59_v29  ;;  %v66_v36 = vsel %vm62_vm5, 1.0, %v64_v33 }
  0x29   :  { %69 = vst [vmem:[#allocation5] sm:$0xff] %v67_v35  ;;  %v68_v37 = vsel %vm32_vm1, %v66_v36, %v60_v31 }
  0x2a   :  { %70 = vst [vmem:[#allocation5 + $0x8] sm:$0xff] %v68_v37 }
  0x2b   :  { %83 = dma.vmem_to_hbm [thread:$0]  %s76_s13, 256, %s78_s16, [#allocation4], %s157_s11, %s157_s11, %s158_s12  }
  0x2c   :  { %154 = dma.done.wait [#allocation4], 256  }
  0x2d   :  { %155 = vsyncadd [#allocation4], 4294967040 }
  0x2e   :  { %88 = vsyncpa [#allocation3], 1 }
  0x2f   :  { %89 = vsyncpa [#allocation4], 1 }

</bundles_post_ra>
